<compile_context>
chip_gen: v5e
topology: v5e:2x2
jax: 0.10.0
libtpu: 0.0.40
codegen_flags: <defaults>
</compile_context>

<pallas_src>
import functools

import jax
import jax.numpy as jnp
from jax.experimental import pallas as pl
from jax.experimental.pallas import tpu as pltpu

_LANES = 128  # per-tile partial sums are stored lane-dense


def _contrastive_loss_kernel(o1_ref, o2_ref, label_ref, psum_ref, *,
                             margin, batch_size, tile_rows, ragged):
    """One batch tile: (TB, D) pair + resident labels -> lane-dense (1, 128) partial sum."""
    i = pl.program_id(0)
    eps = jnp.float32(1e-6)  # matches F.pairwise_distance default eps

    def compute(apply_mask):
        o1 = o1_ref[...].astype(jnp.float32)                     # (TB, D)
        o2 = o2_ref[...].astype(jnp.float32)                     # (TB, D)
        diff = o1 - o2 + eps
        sq_sum = jnp.sum(diff * diff, axis=-1, keepdims=True)    # = d^2, (TB, 1)
        d = jnp.sqrt(sq_sum)                                     # only for the hinge
        hinge = jnp.maximum(jnp.float32(margin) - d, 0.0)
        hinge2 = hinge * hinge

        if apply_mask:
            # Ragged last tile: zero padded rows (also neutralizes garbage/NaN data).
            row = i * tile_rows + jax.lax.broadcasted_iota(jnp.int32, sq_sum.shape, 0)
            valid = row < batch_size
            sq_sum = jnp.where(valid, sq_sum, 0.0)
            hinge2 = jnp.where(valid, hinge2, 0.0)

        # Lane-dense label row for this tile.  Padded labels are 0 and contribute
        # nothing because the matching sq_sum/hinge2 rows are masked to 0 above.
        lab = label_ref[pl.ds(i, 1), :].astype(jnp.float32)      # (1, TB)

        # sum((1-l)*d^2) + sum(l*hinge^2) as (1,TB)x(TB,1) dots on the idle MXU
        # (avoids transposing the lane-dense labels into the sublane layout).
        partial = (jnp.dot(1.0 - lab, sq_sum, preferred_element_type=jnp.float32)
                   + jnp.dot(lab, hinge2, preferred_element_type=jnp.float32))  # (1, 1)
        psum_ref[...] = jnp.broadcast_to(partial, psum_ref.shape)

    if ragged:  # static: only emit masking code when the last tile is ragged
        last = pl.num_programs(0) - 1

        @pl.when(i != last)
        def _():
            compute(False)

        @pl.when(i == last)
        def _():
            compute(True)
    else:
        compute(False)


def _pick_tile_rows(B, D, itemsize):
    """Rows per batch tile: ~8 MiB per input block, rounded to the sublane packing."""
    per_block_budget = 8 * 1024 * 1024        # 2 inputs x 2 buffers -> ~32 MiB VMEM
    tb = per_block_budget // max(1, D * itemsize)
    mult = max(8, 32 // itemsize)             # f32: 8, bf16: 16, int8/fp8: 32
    tb = max(mult, (tb // mult) * mult)
    if tb >= B:
        return B                              # whole (small) batch in one block
    return tb


def contrastive_loss(output1, output2, label, margin=2.0, *, tile_rows=None):
    """output1, output2: (B, D); label: (B,) or (B, 1). Returns scalar f32 loss."""
    B, D = output1.shape
    itemsize = jnp.dtype(output1.dtype).itemsize

    tb = tile_rows if tile_rows is not None else _pick_tile_rows(B, D, itemsize)
    tb = min(int(tb), B)
    num_tiles = pl.cdiv(B, tb)
    ragged = (B % tb) != 0

    # Lane-dense labels: pad to num_tiles*tb and reshape to (num_tiles, tb).  Constant
    # index_map -> the whole (tiny) block is DMA'd once and stays resident in VMEM.
    lab = jnp.reshape(label, (-1,)).astype(jnp.float32)
    pad = num_tiles * tb - B
    if pad:
        lab = jnp.pad(lab, (0, pad))
    lab = jnp.reshape(lab, (num_tiles, tb))

    kernel = functools.partial(
        _contrastive_loss_kernel,
        margin=float(margin), batch_size=B, tile_rows=tb, ragged=ragged)

    cost = pl.CostEstimate(
        flops=int(4 * B * D + 10 * B),
        transcendentals=int(B),               # one sqrt per sample
        bytes_accessed=int(2 * B * D * itemsize + num_tiles * tb * 4
                           + num_tiles * _LANES * 4))

    psums = pl.pallas_call(
        kernel,
        out_shape=jax.ShapeDtypeStruct((num_tiles, _LANES), jnp.float32),
        grid=(num_tiles,),
        in_specs=[
            pl.BlockSpec((tb, D), lambda i: (i, 0)),            # output1 tile
            pl.BlockSpec((tb, D), lambda i: (i, 0)),            # output2 tile
            pl.BlockSpec((num_tiles, tb), lambda i: (0, 0)),    # labels, resident
        ],
        out_specs=pl.BlockSpec((1, _LANES), lambda i: (i, 0)),
        compiler_params=pltpu.CompilerParams(
            dimension_semantics=("parallel",),
            vmem_limit_bytes=48 * 1024 * 1024),
        cost_estimate=cost,
    )(output1, output2, lab)

    # Tiny final reduction over num_tiles partials + mean over the true batch size.
    return jnp.sum(psums[:, 0]) / jnp.float32(B)


def _reference_loss(output1, output2, label, margin=2.0):
    # Pure-JAX reference mirroring the PyTorch forward exactly.
    d = jnp.sqrt(jnp.sum(
        (output1.astype(jnp.float32) - output2.astype(jnp.float32) + 1e-6) ** 2,
        axis=-1, keepdims=True))
    label = jnp.reshape(label, (-1, 1)).astype(jnp.float32)
    return jnp.mean((1.0 - label) * d ** 2
                    + label * jnp.maximum(margin - d, 0.0) ** 2)


if __name__ == "__main__":
    key = jax.random.PRNGKey(0)
    k1, k2, k3 = jax.random.split(key, 3)

    # Small Siamese embedding batch; D lane-aligned.  Single-tile fast path.
    B, D = 8, 128
    output1 = jax.random.normal(k1, (B, D), dtype=jnp.float32)
    output2 = jax.random.normal(k2, (B, D), dtype=jnp.float32)
    label = jax.random.bernoulli(k3, p=0.5, shape=(B, 1)).astype(jnp.float32)

    loss = jax.block_until_ready(contrastive_loss(output1, output2, label, margin=2.0))
    ref = _reference_loss(output1, output2, label, margin=2.0)
    assert jnp.allclose(loss, ref, rtol=1e-5, atol=1e-5), (loss, ref)

    # Multi-tile + ragged-last-tile path (forced small tile to exercise the masking,
    # the resident lane-dense label block, and the pl.when gating).
    B2, D2 = 20, 128
    k4, k5, k6 = jax.random.split(jax.random.PRNGKey(1), 3)
    o1b = jax.random.normal(k4, (B2, D2), dtype=jnp.float32)
    o2b = jax.random.normal(k5, (B2, D2), dtype=jnp.float32)
    lb = jax.random.bernoulli(k6, p=0.5, shape=(B2, 1)).astype(jnp.float32)

    loss2 = jax.block_until_ready(
        contrastive_loss(o1b, o2b, lb, margin=2.0, tile_rows=8))
    ref2 = _reference_loss(o1b, o2b, lb, margin=2.0)
    assert jnp.allclose(loss2, ref2, rtol=1e-5, atol=1e-5), (loss2, ref2)

    print("KERNEL_OK")
</pallas_src>

<mosaic_0001>
module attributes {stable_mosaic.version = 11 : i64} {
  func.func @_contrastive_loss_kernel(%arg0: i32, %arg1: memref<8x128xf32, #tpu.memory_space<vmem>>, %arg2: memref<8x128xf32, #tpu.memory_space<vmem>>, %arg3: memref<1x8xf32, #tpu.memory_space<vmem>>, %arg4: memref<1x128xf32, #tpu.memory_space<vmem>>) attributes {dimension_semantics = [#tpu.dimension_semantics<parallel>], iteration_bounds = array<i64: 1>, scalar_prefetch = 0 : i64, scratch_operands = 0 : i64, tpu.core_type = #tpu.core_type<tc>, window_params = [{transform_indices = @transform_0, window_bounds = array<i64: 8, 128>}, {transform_indices = @transform_1, window_bounds = array<i64: 8, 128>}, {pipeline_mode = #tpu.pipeline_mode<synchronous>, transform_indices = @transform_2, window_bounds = array<i64: 1, 8>}, {transform_indices = @transform_3, window_bounds = array<i64: 1, 128>}]} {
    %c0 = arith.constant 0 : index
    %c0_0 = arith.constant 0 : index
    %0 = vector.load %arg1[%c0, %c0_0] : memref<8x128xf32, #tpu.memory_space<vmem>>, vector<8x128xf32>
    %c0_1 = arith.constant 0 : index
    %c0_2 = arith.constant 0 : index
    %1 = vector.load %arg2[%c0_1, %c0_2] : memref<8x128xf32, #tpu.memory_space<vmem>>, vector<8x128xf32>
    %2 = arith.subf %0, %1 : vector<8x128xf32>
    %cst = arith.constant 9.99999997E-7 : f32
    %3 = vector.broadcast %cst : f32 to vector<8x128xf32>
    %4 = arith.addf %2, %3 : vector<8x128xf32>
    %5 = arith.mulf %4, %4 : vector<8x128xf32>
    %cst_3 = arith.constant dense<0.000000e+00> : vector<8xf32>
    %6 = vector.multi_reduction <add>, %5, %cst_3 [1] : vector<8x128xf32> to vector<8xf32>
    %7 = vector.shape_cast %6 : vector<8xf32> to vector<8x1xf32>
    %8 = math.sqrt %7 : vector<8x1xf32>
    %cst_4 = arith.constant 2.000000e+00 : f32
    %9 = vector.broadcast %cst_4 : f32 to vector<8x1xf32>
    %10 = arith.subf %9, %8 : vector<8x1xf32>
    %cst_5 = arith.constant 0.000000e+00 : f32
    %11 = vector.broadcast %cst_5 : f32 to vector<8x1xf32>
    %12 = arith.maximumf %10, %11 : vector<8x1xf32>
    %13 = arith.mulf %12, %12 : vector<8x1xf32>
    %14 = arith.index_cast %arg0 : i32 to index
    %c0_6 = arith.constant 0 : index
    %15 = vector.load %arg3[%14, %c0_6] : memref<1x8xf32, #tpu.memory_space<vmem>>, vector<1x8xf32>
    %cst_7 = arith.constant 1.000000e+00 : f32
    %16 = vector.broadcast %cst_7 : f32 to vector<1x8xf32>
    %17 = arith.subf %16, %15 : vector<1x8xf32>
    %cst_8 = arith.constant dense<0.000000e+00> : vector<1x1xf32>
    %18 = tpu.matmul %17, %7, %cst_8 {dimension_numbers = #tpu.dot_dimension_numbers<[1], [0], [0], [1], [0, 0, 1, 1], [], []>} : vector<1x8xf32>, vector<8x1xf32>, vector<1x1xf32> -> vector<1x1xf32>
    %cst_9 = arith.constant dense<0.000000e+00> : vector<1x1xf32>
    %19 = tpu.matmul %15, %13, %cst_9 {dimension_numbers = #tpu.dot_dimension_numbers<[1], [0], [0], [1], [0, 0, 1, 1], [], []>} : vector<1x8xf32>, vector<8x1xf32>, vector<1x1xf32> -> vector<1x1xf32>
    %20 = arith.addf %18, %19 : vector<1x1xf32>
    %21 = vector.shape_cast %20 : vector<1x1xf32> to vector<1x1xf32>
    %22 = vector.broadcast %21 : vector<1x1xf32> to vector<1x128xf32>
    %c0_10 = arith.constant 0 : index
    %c0_11 = arith.constant 0 : index
    %23 = vector.load %arg4[%c0_10, %c0_11] : memref<1x128xf32, #tpu.memory_space<vmem>>, vector<1x128xf32>
    tpu.vector_store %arg4[%c0_10, %c0_11], %22 {strides = array<i32>} : memref<1x128xf32, #tpu.memory_space<vmem>>, vector<1x128xf32>,
    return
  }
  func.func @transform_0(%arg0: i32) -> (i32, i32) {
    %c0_i32 = arith.constant 0 : i32
    %c0_i32_0 = arith.constant 0 : i32
    return %arg0, %c0_i32 : i32, i32
  }
  func.func @transform_1(%arg0: i32) -> (i32, i32) {
    %c0_i32 = arith.constant 0 : i32
    %c0_i32_0 = arith.constant 0 : i32
    return %arg0, %c0_i32 : i32, i32
  }
  func.func @transform_2(%arg0: i32) -> (i32, i32) {
    %c0_i32 = arith.constant 0 : i32
    %c0_i32_0 = arith.constant 0 : i32
    %c0_i32_1 = arith.constant 0 : i32
    return %c0_i32, %c0_i32_0 : i32, i32
  }
  func.func @transform_3(%arg0: i32) -> (i32, i32) {
    %c0_i32 = arith.constant 0 : i32
    %c0_i32_0 = arith.constant 0 : i32
    return %arg0, %c0_i32 : i32, i32
  }
}

</mosaic_0001>

<bundles_post_ra>
// kernel: tpu_custom_call.1
= control target key start
LH: loop header
LB: loop body
LE: loop exit
PB: predicated region body
PF: predicated region fallthrough
CT: control target
= control target key end

     0   :  { %8 = vsyncpa [#allocation3], 0  ;;  %s263_s0 = inlined_call_operand.hbm [shape: f32[8,128], index: 0, kind: input, shape index: {}]   ;;  %s264_s1 = inlined_call_operand.hbm [shape: f32[8,128], index: 1, kind: input, shape index: {}]   ;;  %s265_s2 = inlined_call_operand.vmem [shape: f32[1,8], index: 2, kind: input, shape index: {}]   ;;  %s266_s3 = inlined_call_operand.hbm [shape: f32[1,128], index: 3, kind: output, shape index: {}]  }
   0x1   :  { %9 = vsyncpa [#allocation6], 0 }
   0x2   :  { %10 = vsyncpa [#allocation4], 0  ;;  %s16_s14 = sshll.u32 %s263_s0, 4  ;;  %s225_s15 = smov [#allocation2]   ;;  %s17_s14 = int_to_ptr.hbm [resolvable:$true] %s16_s14 }
   0x3   :  { %s18_s16 = sshll.u32 %s225_s15, 4  ;;  %s27_s19 = sshll.u32 %s264_s1, 4  ;;  %s19_s16 = int_to_ptr.vmem [resolvable:$true] %s18_s16  ;;  %s28_s19 = int_to_ptr.hbm [resolvable:$true] %s27_s19 }
   0x4   :  { %21 = dma.hbm_to_vmem [thread:$0]  %s17_s14, 128, %s19_s16, [#allocation3]  }
   0x5   :  { %s226_s20 = smov [#allocation5]  }
   0x6   :  { %s29_s21 = sshll.u32 %s226_s20, 4  ;;  %s30_s21 = int_to_ptr.vmem [resolvable:$true] %s29_s21 }
   0x7   :  { %32 = dma.hbm_to_vmem [thread:$0]  %s28_s19, 128, %s30_s21, [#allocation6]  }
   0x8   :  { %219 = dma.done.wait [#allocation3], 128  }
   0x9   :  { %220 = vsyncadd [#allocation3], 4294967168 }
   0xa   :  { %221 = dma.done.wait [#allocation6], 128  }
   0xb   :  { %222 = vsyncadd [#allocation6], 4294967168  ;;  %v43_v0 = vld [vmem:[#allocation2] sm:$0xff]  ;;  %v44_v1 = vld [vmem:[#allocation5] sm:$0xff]  ;;  %vm67_vm0 = vcmask 64512   ;;  %v227_v21 = vmov 0  }
   0xc   :  { %v45_v2 = vsub.f32 %v43_v0, %v44_v1  ;;  %v65_v5 = vld [vmem:[%s265_s2] sm:$0x1]  ;;  %144 = vset.pattern.permute.xlu0 %v227_v21  ;;  %s228_s1 = smov [#allocation7]   ;;  %s127_s25 = sshll.u32 %s266_s3, 4  ;;  %s128_s25 = int_to_ptr.hbm [resolvable:$true] %s127_s25 }
   0xd   :  { %v66_v6 = vsub.f32 1.0, %v65_v5  ;;  %s125_s2 = sshll.u32 %s228_s1, 4  ;;  %s126_s2 = int_to_ptr.vmem [resolvable:$true] %s125_s2 }
   0xe   :  { %v46_v3 = vadd.f32 1e-06, %v45_v2 }
  0x10   :  { %v47_v4 = vmul.f32 %v46_v3, %v46_v3 }
  0x12   :  { %48 = vadd.xlane.f32.xlu0 %v47_v4 }
  0x85   :  { %v49_v7 = vpop.xlane.xlu0 %48 }
  0x86   :  { %145 = vrsqrt.f32 %v49_v7  ;;  %109 = vmatpush.msra.mxu1 %v49_v7  ;;  %vm57_vm1 = vcmp.eq.f32.partialorder %v49_v7, inf  ;;  %v60_v15 = vand.u32 2147483648, %v49_v7  ;;  %vm59_vm2 = vcmp.eq.f32.partialorder %v49_v7, 0.0 }
  0x87   :  { %139 = vmatmul.msk.f32.vlgmr.msra.gmra.mxu1 %vm67_vm0, %v66_v6 }
  0x8c   :  { %v146_v8 = vpop.eup %145 }
  0x8d   :  { %v51_v9 = vmul.f32 %v146_v8, %v49_v7 }
  0x8f   :  { %v52_v10 = vmul.f32 %v146_v8, %v51_v9 }
  0x91   :  { %v53_v11 = vmul.f32 0.5, %v52_v10 }
  0x93   :  { %v54_v12 = vsub.f32 1.5, %v53_v11 }
  0x95   :  { %v55_v13 = vmul.f32 %v146_v8, %v54_v12 }
  0x97   :  { %v56_v14 = vmul.f32 %v55_v13, %v49_v7 }
  0x99   :  { %v58_v16 = vsel %vm57_vm1, %v49_v7, %v56_v14 }
  0x9a   :  { %v61_v17 = vsel %vm59_vm2, %v60_v15, %v58_v16 }
  0x9b   :  { %v62_v18 = vsub.f32 2.0, %v61_v17 }
  0x9d   :  { %v63_v19 = vmax.f32 %v62_v18, 0.0 }
  0x9f   :  { %v64_v20 = vmul.f32 %v63_v19, %v63_v19 }
  0xa1   :  { %86 = vmatpush.msra.mxu0 %v64_v20 }
  0xa2   :  { %138 = vmatmul.msk.f32.vlgmr.msra.gmra.mxu0 %vm67_vm0, %v65_v5 }
 0x104   :  { %v111_v22 = vpop.f32.mrf.mxu1 }
 0x11f   :  { %v88_v23 = vpop.f32.mrf.mxu0 }
 0x120   :  { %v112_v24 = vadd.f32 %v111_v22, %v88_v23 }
 0x122   :  { %116 = vperm.xlu0 %144, %v112_v24  }
 0x194   :  { %v117_v25 = vpop.permute.xlu0 %116 }
 0x195   :  { %119 = vst [vmem:[#allocation7] sm:$0x1] %v117_v25 }
 0x196   :  { %130 = dma.vmem_to_hbm [thread:$0]  %s126_s2, 16, %s128_s25, [#allocation4]  }
 0x197   :  { %223 = dma.done.wait [#allocation4], 16  }
 0x198   :  { %224 = vsyncadd [#allocation4], 4294967280 }
 0x199   :  { %135 = vsyncpa [#allocation3], 1 }
 0x19a   :  { %136 = vsyncpa [#allocation6], 1 }
 0x19b   :  { %137 = vsyncpa [#allocation4], 1 }

</bundles_post_ra>
